<compile_context>
chip_gen: v7x
topology: tpu7x:2x2x1
jax: 0.10.0
libtpu: 0.0.40
codegen_flags: <defaults>
</compile_context>

<pallas_src>
import functools

import jax
import jax.numpy as jnp
from jax.experimental import pallas as pl
from jax.experimental.pallas import tpu as pltpu

GAMMA = 2
ALPHA = 0.25
EPS = 1e-10

LANES = 128      # lane width of the flattened slab
SUBLANES = 8     # f32 sublane count (one vreg = (8, 128))


def _num_tensorcores():
    """2 TensorCores only on v7x; single-TC chips (v5e/v6e) get 1."""
    try:
        kind = jax.devices()[0].device_kind.lower()
    except Exception:
        return 1
    return 2 if ("v7" in kind or "tpu7" in kind) else 1


def _pow(v, gamma):
    """v ** gamma; small integer gamma -> repeated multiply (VPU, no EUP)."""
    g = float(gamma)
    if g == int(g) and 0 < int(g) <= 4:
        r = v
        for _ in range(int(g) - 1):
            r = r * v
        return r
    return jnp.power(v, jnp.float32(g))


def _focal_loss_kernel(x_ref, t_ref, o_ref, *,
                       gamma, alpha, eps, tile_rows, tiles_per_core,
                       num_tiles, full_rows, rem_lanes, need_mask,
                       has_overshoot):
    c = pl.program_id(0)   # core / parallel index
    i = pl.program_id(1)   # reduction (tile) index within this core

    @pl.when(i == 0)
    def _():
        o_ref[...] = jnp.zeros_like(o_ref)

    tile_idx = c * tiles_per_core + i

    def compute_loss():
        x = x_ref[...].astype(jnp.float32)
        t = t_ref[...].astype(jnp.float32)
        # Same formulation as the PyTorch reference (sigmoid + log(p + eps));
        # only the float-exponent pow is replaced with explicit squares.
        pt = jax.nn.sigmoid(x)
        one_minus_pt = 1.0 - pt
        return (
            -alpha * _pow(one_minus_pt, gamma) * t * jnp.log(pt + eps)
            - (1.0 - alpha) * _pow(pt, gamma) * (1.0 - t)
            * jnp.log(one_minus_pt + eps)
        )

    def accumulate(vals):
        # vreg-shaped partial accumulation: (tile_rows, 128) -> (8, 128) via
        # pure VPU adds; 4 independent accumulators when the tile is big
        # enough to break up the serial add chain.
        r = vals.reshape(-1, SUBLANES, LANES)
        if r.shape[0] % 4 == 0 and r.shape[0] > 4:
            partial = r.reshape(-1, 4, SUBLANES, LANES).sum(axis=0).sum(axis=0)
        else:
            partial = r.sum(axis=0)
        o_ref[...] += partial[None, :, :]

    if need_mask or has_overshoot:
        # Interior (fully-valid, in-range) tiles: no mask work at all.
        if need_mask:
            plain_cond = tile_idx < (num_tiles - 1)
        else:
            plain_cond = tile_idx < num_tiles

        @pl.when(plain_cond)
        def _():
            accumulate(compute_loss())

        if need_mask:
            # Only the last tile contains lane-pad / ragged-row garbage.
            @pl.when(tile_idx == num_tiles - 1)
            def _():
                loss = compute_loss()
                row0 = tile_idx * tile_rows
                row = jax.lax.broadcasted_iota(jnp.int32, loss.shape, 0) + row0
                valid = row < full_rows
                if rem_lanes:
                    lane = jax.lax.broadcasted_iota(jnp.int32, loss.shape, 1)
                    valid = valid | ((row == full_rows) & (lane < rem_lanes))
                accumulate(jnp.where(valid, loss, 0.0))
        # Overshoot grid points (tile_idx >= num_tiles, only possible with
        # 2 cores and an odd tile count) fall through: DMA of the clamped
        # block happens but nothing is accumulated.
    else:
        accumulate(compute_loss())


def focal_loss(x, target, *, gamma=GAMMA, alpha=ALPHA, eps=EPS,
               reduction="elementwise_mean", max_tile_rows=2048):
    """Sigmoid focal loss matching the PyTorch FocalLoss.forward semantics."""
    assert x.shape == target.shape
    n_elems = int(x.size)
    assert n_elems > 0

    rows = pl.cdiv(n_elems, LANES)
    rem_lanes = n_elems % LANES
    full_rows = n_elems // LANES

    # Flatten; only pad the sub-row remainder (<=127 elems) so the 2D reshape
    # is legal.  No full-slab padding to the tile/core quantum anymore.
    xf = jnp.ravel(x)
    tf = jnp.ravel(target)
    lane_pad = rows * LANES - n_elems
    if lane_pad:
        xf = jnp.pad(xf, (0, lane_pad))
        tf = jnp.pad(tf, (0, lane_pad))
    x2 = xf.reshape(rows, LANES)
    t2 = tf.reshape(rows, LANES)

    num_cores = _num_tensorcores()

    # Size-adaptive tile: aim for >= ~4 tiles per core so the BlockSpec
    # pipeline actually overlaps DMA with compute; 8-row aligned, <= 2048
    # rows (1 MiB/input/block, ~4 MiB double-buffered -> fits every chip).
    tile_rows = pl.cdiv(rows, num_cores * 4)
    tile_rows = max(SUBLANES, min(int(tile_rows), int(max_tile_rows)))
    tile_rows = ((tile_rows + SUBLANES - 1) // SUBLANES) * SUBLANES
    if tile_rows >= 32:
        # multiple of 32 enables the 4-way independent partial accumulation
        tile_rows = ((tile_rows + 31) // 32) * 32

    num_tiles = pl.cdiv(rows, tile_rows)
    tiles_per_core = pl.cdiv(num_tiles, num_cores)
    grid_tiles = num_cores * tiles_per_core
    has_overshoot = grid_tiles > num_tiles
    ragged_rows = (rows % tile_rows) != 0
    need_mask = (rem_lanes != 0) or ragged_rows

    def in_index_map(c, i):
        idx = c * tiles_per_core + i
        if has_overshoot:
            idx = jnp.minimum(idx, num_tiles - 1)
        return (idx, 0)

    kernel = functools.partial(
        _focal_loss_kernel,
        gamma=gamma, alpha=alpha, eps=eps,
        tile_rows=tile_rows, tiles_per_core=tiles_per_core,
        num_tiles=num_tiles, full_rows=full_rows, rem_lanes=rem_lanes,
        need_mask=need_mask, has_overshoot=has_overshoot,
    )

    partials = pl.pallas_call(
        kernel,
        out_shape=jax.ShapeDtypeStruct((num_cores, SUBLANES, LANES),
                                       jnp.float32),
        grid_spec=pltpu.PrefetchScalarGridSpec(
            num_scalar_prefetch=0,
            grid=(num_cores, tiles_per_core),
            in_specs=[
                pl.BlockSpec((tile_rows, LANES), in_index_map),
                pl.BlockSpec((tile_rows, LANES), in_index_map),
            ],
            out_specs=pl.BlockSpec((1, SUBLANES, LANES),
                                   lambda c, i: (c, 0, 0)),
        ),
        compiler_params=pltpu.CompilerParams(
            dimension_semantics=("parallel", "arbitrary"),
            vmem_limit_bytes=32 * 1024 * 1024,
        ),
    )(x2, t2)

    total = jnp.sum(partials)
    if reduction == "elementwise_mean":
        return total / jnp.float32(n_elems)
    elif reduction == "sum":
        return total
    else:
        # TODO(synk): reduction='False' (per-element output) is not supported
        # by this sum-accumulating kernel; it would need an elementwise-output
        # variant.
        raise NotImplementedError("Only 'elementwise_mean'/'sum' supported.")


def focal_loss_ref(x, target, *, gamma=GAMMA, alpha=ALPHA, eps=EPS):
    pt = jax.nn.sigmoid(x.astype(jnp.float32))
    t = target.astype(jnp.float32)
    loss = (
        -alpha * (1.0 - pt) ** gamma * t * jnp.log(pt + eps)
        - (1.0 - alpha) * pt ** gamma * (1.0 - t) * jnp.log(1.0 - pt + eps)
    )
    return jnp.mean(loss)


if __name__ == "__main__":
    key = jax.random.PRNGKey(0)
    k1, k2 = jax.random.split(key)

    # NCHW inputs, small shapes: logits and binary targets.
    B, C, H, W = 2, 4, 16, 16
    x = jax.random.normal(k1, (B, C, H, W), dtype=jnp.float32)
    target = jax.random.bernoulli(k2, p=0.3, shape=(B, C, H, W)).astype(jnp.float32)

    out = focal_loss(x, target)
    out = jax.block_until_ready(out)

    ref = focal_loss_ref(x, target)
    assert jnp.allclose(out, ref, atol=1e-5, rtol=1e-5), (out, ref)

    print("KERNEL_OK")
</pallas_src>

<mosaic_0001>
module attributes {stable_mosaic.version = 11 : i64} {
  func.func @_focal_loss_kernel(%arg0: i32, %arg1: i32, %arg2: memref<8x128xf32, #tpu.memory_space<vmem>>, %arg3: memref<8x128xf32, #tpu.memory_space<vmem>>, %arg4: memref<1x8x128xf32, #tpu.memory_space<vmem>>) attributes {dimension_semantics = [#tpu.dimension_semantics<parallel>, #tpu.dimension_semantics<arbitrary>], iteration_bounds = array<i64: 1, 2>, scalar_prefetch = 0 : i64, scratch_operands = 0 : i64, tpu.core_type = #tpu.core_type<tc>, window_params = [{transform_indices = @transform_0, window_bounds = array<i64: 8, 128>}, {transform_indices = @transform_1, window_bounds = array<i64: 8, 128>}, {transform_indices = @transform_2, window_bounds = array<i64: 1, 8, 128>}]} {
    %c0_i32 = arith.constant 0 : i32
    %0 = arith.cmpi eq, %arg1, %c0_i32 : i32
    %1 = arith.extui %0 : i1 to i32
    %c0_i32_0 = arith.constant 0 : i32
    %2 = arith.cmpi ne, %1, %c0_i32_0 : i32
    scf.if %2 {
      %cst_17 = arith.constant 0.000000e+00 : f32
      %37 = vector.broadcast %cst_17 : f32 to vector<1x8x128xf32>
      %c0_18 = arith.constant 0 : index
      %c0_19 = arith.constant 0 : index
      %c0_20 = arith.constant 0 : index
      %38 = vector.load %arg4[%c0_18, %c0_19, %c0_20] : memref<1x8x128xf32, #tpu.memory_space<vmem>>, vector<1x8x128xf32>
      tpu.vector_store %arg4[%c0_18, %c0_19, %c0_20], %37 {strides = array<i32>} : memref<1x8x128xf32, #tpu.memory_space<vmem>>, vector<1x8x128xf32>,
    } else {
    }
    %c0 = arith.constant 0 : index
    %c0_1 = arith.constant 0 : index
    %3 = vector.load %arg2[%c0, %c0_1] : memref<8x128xf32, #tpu.memory_space<vmem>>, vector<8x128xf32>
    %c0_2 = arith.constant 0 : index
    %c0_3 = arith.constant 0 : index
    %4 = vector.load %arg3[%c0_2, %c0_3] : memref<8x128xf32, #tpu.memory_space<vmem>>, vector<8x128xf32>
    %5 = arith.negf %3 : vector<8x128xf32>
    %6 = math.exp %5 : vector<8x128xf32>
    %cst = arith.constant 1.000000e+00 : f32
    %7 = vector.broadcast %cst : f32 to vector<8x128xf32>
    %8 = arith.addf %7, %6 : vector<8x128xf32>
    %9 = arith.divf %7, %8 : vector<8x128xf32>
    %cst_4 = arith.constant 1.000000e+00 : f32
    %10 = vector.broadcast %cst_4 : f32 to vector<8x128xf32>
    %11 = arith.subf %10, %9 : vector<8x128xf32>
    %12 = arith.mulf %11, %11 : vector<8x128xf32>
    %cst_5 = arith.constant -2.500000e-01 : f32
    %13 = vector.broadcast %cst_5 : f32 to vector<8x128xf32>
    %14 = arith.mulf %13, %12 : vector<8x128xf32>
    %15 = arith.mulf %14, %4 : vector<8x128xf32>
    %cst_6 = arith.constant 1.000000e-10 : f32
    %16 = vector.broadcast %cst_6 : f32 to vector<8x128xf32>
    %17 = arith.addf %9, %16 : vector<8x128xf32>
    %18 = math.log %17 : vector<8x128xf32>
    %19 = arith.mulf %15, %18 : vector<8x128xf32>
    %20 = arith.mulf %9, %9 : vector<8x128xf32>
    %cst_7 = arith.constant 7.500000e-01 : f32
    %21 = vector.broadcast %cst_7 : f32 to vector<8x128xf32>
    %22 = arith.mulf %21, %20 : vector<8x128xf32>
    %cst_8 = arith.constant 1.000000e+00 : f32
    %23 = vector.broadcast %cst_8 : f32 to vector<8x128xf32>
    %24 = arith.subf %23, %4 : vector<8x128xf32>
    %25 = arith.mulf %22, %24 : vector<8x128xf32>
    %cst_9 = arith.constant 1.000000e-10 : f32
    %26 = vector.broadcast %cst_9 : f32 to vector<8x128xf32>
    %27 = arith.addf %11, %26 : vector<8x128xf32>
    %28 = math.log %27 : vector<8x128xf32>
    %29 = arith.mulf %25, %28 : vector<8x128xf32>
    %30 = arith.subf %19, %29 : vector<8x128xf32>
    %31 = vector.shape_cast %30 : vector<8x128xf32> to vector<1x8x128xf32>
    %cst_10 = arith.constant dense<0.000000e+00> : vector<8x128xf32>
    %32 = vector.multi_reduction <add>, %31, %cst_10 [0] : vector<1x8x128xf32> to vector<8x128xf32>
    %c0_11 = arith.constant 0 : index
    %c0_12 = arith.constant 0 : index
    %c0_13 = arith.constant 0 : index
    %33 = vector.load %arg4[%c0_11, %c0_12, %c0_13] : memref<1x8x128xf32, #tpu.memory_space<vmem>>, vector<1x8x128xf32>
    %34 = vector.shape_cast %32 : vector<8x128xf32> to vector<1x8x128xf32>
    %35 = arith.addf %33, %34 : vector<1x8x128xf32>
    %c0_14 = arith.constant 0 : index
    %c0_15 = arith.constant 0 : index
    %c0_16 = arith.constant 0 : index
    %36 = vector.load %arg4[%c0_14, %c0_15, %c0_16] : memref<1x8x128xf32, #tpu.memory_space<vmem>>, vector<1x8x128xf32>
    tpu.vector_store %arg4[%c0_14, %c0_15, %c0_16], %35 {strides = array<i32>} : memref<1x8x128xf32, #tpu.memory_space<vmem>>, vector<1x8x128xf32>,
    return
  }
  func.func @transform_0(%arg0: i32, %arg1: i32) -> (i32, i32) {
    %c2_i32 = arith.constant 2 : i32
    %0 = arith.muli %arg0, %c2_i32 : i32
    %1 = arith.addi %0, %arg1 : i32
    %c0_i32 = arith.constant 0 : i32
    %c0_i32_0 = arith.constant 0 : i32
    return %1, %c0_i32 : i32, i32
  }
  func.func @transform_1(%arg0: i32, %arg1: i32) -> (i32, i32) {
    %c2_i32 = arith.constant 2 : i32
    %0 = arith.muli %arg0, %c2_i32 : i32
    %1 = arith.addi %0, %arg1 : i32
    %c0_i32 = arith.constant 0 : i32
    %c0_i32_0 = arith.constant 0 : i32
    return %1, %c0_i32 : i32, i32
  }
  func.func @transform_2(%arg0: i32, %arg1: i32) -> (i32, i32, i32) {
    %c0_i32 = arith.constant 0 : i32
    %c0_i32_0 = arith.constant 0 : i32
    %c0_i32_1 = arith.constant 0 : i32
    return %arg0, %c0_i32, %c0_i32_0 : i32, i32, i32
  }
}

</mosaic_0001>

<bundles_post_ra>
// kernel: tpu_custom_call.1
= control target key start
LH: loop header
LB: loop body
LE: loop exit
PB: predicated region body
PF: predicated region fallthrough
CT: control target
= control target key end

     0   :  { %7 = vsyncpa [#allocation3], 0  ;;  %s803_s0 = inlined_call_operand.hbm [shape: f32[16,128], index: 0, kind: input, shape index: {}]   ;;  %s804_s1 = inlined_call_operand.hbm [shape: f32[16,128], index: 1, kind: input, shape index: {}]   ;;  %s805_s2 = inlined_call_operand.hbm [shape: f32[1,8,128], index: 2, kind: output, shape index: {}]  }
   0x1   :  { %9 = vsyncpa [#allocation3 + $0x1], 0 }
   0x2   :  { %10 = vsyncpa [#allocation6], 0 }
   0x3   :  { %12 = vsyncpa [#allocation6 + $0x1], 0 }
   0x4   :  { %13 = vsyncpa [#allocation4], 0  ;;  %s605_s9 = smov 0   ;;  %s607_s10 = smov 0  }
   0x5   :  { %s609_s11 = smov 0   ;;  %s611_s12 = smov 0  }
   0x6   :  { %s613_s13 = smov 0   ;;  %s615_s14 = smov 0  }
   0x7 LB: > { %s348_s15 = sadd.s32 4294967295, %s584_s14   ;;  %s28_s16 = sadd.s32 1, %s580_s13  ;;  %s584_s14 = sphi %s615_s14, %s19_s14   ;;  %s580_s13 = sphi %s613_s13, %s820_s13   ;;  %s576_s12 = sphi %s611_s12, %s819_s12   ;;  %s572_s11 = sphi %s609_s11, %s818_s11   ;;  %s568_s10 = sphi %s607_s10, %s817_s10   ;;  %s564_s9 = sphi %s605_s9, %s816_s9  }
   0x8   : > { %p29_p0 = scmp.ge.s32.totalorder %s28_s16, 2  ;;  %s42_s17 = sadd.s32 1, %s572_s11 }
   0x9   : > { %p49_p1 = scmp.ne.s32.totalorder %s572_s11, %s568_s10  ;;  %p50_p2 = scmp.eq.s32.totalorder %s584_s14, 0 }
   0xa   : > { %s822_s16 = smov (%p29_p0, %s28_s16), 0  ;;  %p55_p4 = scmp.ne.s32.totalorder %s568_s10, %s564_s9 }
   0xb   : > { %p641_p3 = por %p50_p2, %p49_p1  ;;  %s39_s19 = ssub.s32 %s580_s13, %s822_s16 }
   0xc   : > { %p56_p5 = scmp.eq.s32.totalorder %s348_s15, 0  ;;  %p40_p6 = scmp.eq.s32.totalorder %s39_s19, 0 }
   0xd   : > { %p379_p8 = scmp.lt.s32.totalorder %s584_s14, 2  ;;  %s659_s22 = sand.u32 1, %s572_s11  }
   0xe   : > { %p650_p7 = por %p56_p5, %p55_p4  ;;  %s352_s23 = sshll.u32 %s580_s13, 7 }
   0xf   : > { %s656_s21 = scalar_select %p40_p6, %s572_s11, %s42_s17  }
  0x10   : > { %s808_s20 = scalar_select %p650_p7, 1, 0 }
  0x11   : > { %s351_s24 = sshll.u32 %s659_s22, 3  ;;  %s668_s27 = scalar_lea.hbm %s803_s0, %s352_s23 }
  0x12   : > { %s139_s28 = scalar_lea.vmem [#allocation2], %s351_s24  ;;  %p674_p9 = pnand %p379_p8, %p641_p3 }
  0x13   : > { %s148_s29 = sshll.u32 %s139_s28, 4  ;;  %s136_s3 = scalar_lea.sflag [#allocation3], %s659_s22  ;;  %s678_s29 = int_to_ptr.vmem [resolvable:$true] %s148_s29 }
  0x14   : > { %s440_s4 = scalar_lea.hbm %s668_s27, 128  ;;  %p442_p13 = pneg %p674_p9 }
  0x15   : > { %p441_p12 = scmp.ne.s32.totalorder %s668_s27, %s440_s4  ;;  %s445_s7 = scalar_lea.hbm %s803_s0, 256 }
  0x16   : > { %p446_p2 = scmp.lt.u32.totalorder %s668_s27, %s803_s0  ;;  %p447_p3 = scmp.lt.u32.totalorder %s445_s7, %s440_s4 }
  0x17   : > { %p443_p0 = pnand %p442_p13, %p441_p12  ;;  %p449_p5 = scmp.lt.u32.totalorder %s440_s4, %s668_s27 }
  0x18   : > { %p448_p4 = por %p447_p3, %p446_p2 }
  0x19   : > { %p444_p1 = pneg %p443_p0 }
  0x1a   : > { %p450_p6 = por %p449_p5, %p448_p4 }
  0x1c   : > { %p451_p8 = pnand %p450_p6, %p444_p1 }
  0x1e   : > { %454 = shalt.err (!%p451_p8)
}
  0x1f   : > { %s455_s17 = scalar_lea.vmem %s678_s29, 128  ;;  %s586_s18 = smov [#allocation2]  }
  0x20   : > { %p456_p12 = scmp.ne.s32.totalorder %s678_s29, %s455_s17  ;;  %s460_s19 = sshll.u32 %s586_s18, 4  ;;  %s461_s19 = int_to_ptr.vmem [resolvable:$false] %s460_s19 }
  0x21   : > { %s462_s25 = scalar_lea.vmem %s461_s19, 256  ;;  %p463_p11 = scmp.lt.s32.totalorder %s678_s29, %s461_s19 }
  0x22   : > { %p458_p0 = pnand %p456_p12, %p442_p13  ;;  %p464_p2 = scmp.lt.s32.totalorder %s462_s25, %s455_s17 }
  0x24   : > { %p459_p10 = pneg %p458_p0  ;;  %p465_p3 = por %p464_p2, %p463_p11 }
  0x26   : > { %p466_p4 = pnand %p465_p3, %p459_p10 }
  0x28   : > { %469 = shalt.err (!%p466_p4)
}
  0x29   : > { %375 = dma.hbm_to_vmem [thread:$0]  (!%p674_p9), %s668_s27, 128, %s678_s29, %s136_s3  }
  0x2a   : > { %p810_p1 = scmp.lt.s32.totalorder %s584_s14, 3  ;;  %p811_p5 = scmp.ge.s32.totalorder %s584_s14, 1 }
  0x2b   : > { %s721_s5 = scalar_lea.hbm %s804_s1, %s352_s23  ;;  %s159_s6 = scalar_lea.vmem [#allocation5], %s351_s24 }
  0x2c   : > { %p712_p6 = pnand %p811_p5, %p810_p1  ;;  %s168_s7 = sshll.u32 %s159_s6, 4  ;;  %s169_s7 = int_to_ptr.vmem [resolvable:$true] %s168_s7 }
  0x2d   : > { %s156_s27 = scalar_lea.sflag [#allocation6], %s659_s22  ;;  %s470_s29 = scalar_lea.hbm %s721_s5, 128 }
  0x2e   : > { %s812_s26 = scalar_select %p712_p6, 1, 0 }
  0x2f   : > { %p471_p10 = scmp.ne.s32.totalorder %s721_s5, %s470_s29  ;;  %s475_s23 = scalar_lea.hbm %s804_s1, 256 }
  0x30   : > { %p476_p12 = scmp.lt.u32.totalorder %s721_s5, %s804_s1  ;;  %p477_p0 = scmp.lt.u32.totalorder %s475_s23, %s470_s29 }
  0x31   : > { %p473_p11 = pnand %p471_p10, %p442_p13  ;;  %p479_p3 = scmp.lt.u32.totalorder %s470_s29, %s721_s5 }
  0x32   : > { %p478_p2 = por %p477_p0, %p476_p12 }
  0x33   : > { %p474_p8 = pneg %p473_p11 }
  0x34   : > { %p480_p4 = por %p479_p3, %p478_p2 }
  0x36   : > { %p481_p1 = pnand %p480_p4, %p474_p8 }
  0x38   : > { %484 = shalt.err (!%p481_p1)
}
  0x39   : > { %s485_s22 = scalar_lea.vmem %s169_s7, 128  ;;  %s587_s24 = smov [#allocation5]  }
  0x3a   : > { %p486_p5 = scmp.ne.s32.totalorder %s169_s7, %s485_s22  ;;  %s490_s18 = sshll.u32 %s587_s24, 4  ;;  %s491_s18 = int_to_ptr.vmem [resolvable:$false] %s490_s18 }
  0x3b   : > { %s492_s19 = scalar_lea.vmem %s491_s18, 256  ;;  %p493_p7 = scmp.lt.s32.totalorder %s169_s7, %s491_s18 }
  0x3c   : > { %p488_p10 = pnand %p486_p5, %p442_p13  ;;  %p494_p6 = scmp.lt.s32.totalorder %s492_s19, %s485_s22 }
  0x3e   : > { %p489_p11 = pneg %p488_p10  ;;  %p495_p0 = por %p494_p6, %p493_p7 }
  0x40   : > { %p496_p12 = pnand %p495_p0, %p489_p11 }
  0x42   : > { %499 = shalt.err (!%p496_p12)
}
  0x43   : > { %378 = dma.hbm_to_vmem [thread:$0]  (!%p674_p9), %s721_s5, 128, %s169_s7, %s156_s27  }
  0x44   : > { %p813_p8 = scmp.ne.s32.totalorder %s812_s26, 0 }
  0x45   : > { %s179_s25 = sand.u32 (!%p813_p8), 1, %s568_s10   ;;  %p814_p13 = scmp.ne.s32.totalorder (!%p813_p8), %s808_s20, 0 }
  0x46   : > { %177 = sbr.rel (%p813_p8) target bundleno = 154 (0x9a), region = 28  ;;  %s356_s28 = sshll.u32 (!%p813_p8), %s179_s25, 3 }
  0x47   : > { %s180_s4 = scalar_lea.sflag (!%p813_p8), [#allocation3], %s179_s25  ;;  %s183_s6 = scalar_lea.vmem (!%p813_p8), [#allocation2], %s356_s28 }
  0x4d   : > { %551 = dma.done.wait (%p814_p13), %s180_s4, 128  }
  0x4e   : > { %553 = vsyncadd (%p814_p13), %s180_s4, 4294967168  ;;  %s189_s29 = scalar_lea.sflag [#allocation6], %s179_s25  ;;  %s192_s3 = scalar_lea.vmem [#allocation5], %s356_s28 }
  0x4f   : > { %555 = dma.done.wait (%p814_p13), %s189_s29, 128  }
  0x50   : > { %557 = vsyncadd (%p814_p13), %s189_s29, 4294967168  ;;  %p358_p7 = scmp.ne.s32.totalorder %s576_s12, 0 }
  0x51   : > { %v588_v0 = vmov (!%p358_p7), 0.0  }
  0x52   : > { %220 = sbr.rel (%p358_p7) target bundleno = 89 (0x59), region = 40  ;;  %221 = vst [vmem:[#allocation7] sm:$0xff] (!%p358_p7), %v588_v0 }
  0x59 PF: > { %v222_v1 = vld [vmem:[%s183_s6] sm:$0xff]  ;;  %v223_v11 = vld [vmem:[%s192_s3] sm:$0xff]  ;;  %s589_s12 = smov [#allocation7]   ;;  %p759_p9 = scmp.eq.s32.totalorder %s348_s15, 1 }
  0x5a   : > { %v359_v2 = vmul.f32 -1.442695, %v222_v1  ;;  %v240_v14 = vsub.f32 1.0, %v223_v11  ;;  %v248_v23 = vld [vmem:[#allocation7] sm:$0xff]  ;;  %s260_s20 = sshll.u32 %s589_s12, 4  ;;  %s261_s20 = int_to_ptr.vmem [resolvable:$true] %s260_s20 }
  0x5b   : > { %s500_s26 = scalar_lea.vmem %s261_s20, 128  ;;  %p507_p4 = scmp.lt.s32.totalorder %s261_s20, %s261_s20 }
  0x5c   : > { %432 = vpow2.f32 %v359_v2  ;;  %p501_p6 = scmp.ne.s32.totalorder %s261_s20, %s500_s26  ;;  %p508_p1 = scmp.lt.s32.totalorder %s500_s26, %s500_s26 }
  0x5e   : > { %p502_p2 = pnand %p501_p6, %p759_p9  ;;  %p509_p5 = por %p508_p1, %p507_p4 }
  0x60   : > { %p503_p3 = pneg %p502_p2 }
  0x62   : > { %p510_p10 = pnand %p509_p5, %p503_p3 }
  0x66   : > { %v433_v3 = vpop.eup %432 }
  0x67   : > { %v227_v4 = vadd.f32 1.0, %v433_v3 }
  0x69   : > { %434 = vrcp.f32 %v227_v4 }
  0x73   : > { %v435_v5 = vpop.eup %434 }
  0x74   : > { %v230_v6 = vsub.f32 1.0, %v435_v5  ;;  %v234_v7 = vadd.f32 1e-10, %v435_v5  ;;  %v238_v10 = vmul.f32 %v435_v5, %v435_v5 }
  0x76   : > { %436 = vlog2.f32 %v234_v7  ;;  %v242_v8 = vadd.f32 1e-10, %v230_v6  ;;  %v231_v9 = vmul.f32 %v230_v6, %v230_v6  ;;  %v239_v13 = vmul.f32 0.75, %v238_v10 }
  0x78   : > { %438 = vlog2.f32 %v242_v8  ;;  %v232_v12 = vmul.f32 -0.25, %v231_v9  ;;  %v241_v18 = vmul.f32 %v240_v14, %v239_v13 }
  0x7a   : > { %v233_v15 = vmul.f32 %v232_v12, %v223_v11 }
  0x80   : > { %v437_v16 = vpop.eup %436 }
  0x81   : > { %v236_v17 = vmul.f32 0.6931472, %v437_v16 }
  0x82   : > { %v439_v19 = vpop.eup %438 }
  0x83   : > { %v237_v20 = vmul.f32 %v236_v17, %v233_v15  ;;  %v244_v21 = vmul.f32 0.6931472, %v439_v19 }
  0x85   : > { %v245_v22 = vmul.f32 %v244_v21, %v241_v18 }
  0x87   : > { %v246_v24 = vsub.f32 %v237_v20, %v245_v22 }
  0x89   : > { %v249_v25 = vadd.f32 %v248_v23, %v246_v24 }
  0x8b   : > { %250 = vst [vmem:[#allocation7] sm:$0xff] %v249_v25 }
  0x8c   : > { %513 = shalt.err (!%p510_p10)
}
  0x8d   : > { %s514_s15 = scalar_lea.hbm %s805_s2, 128 }
  0x8e   : > { %p515_p11 = scmp.ne.s32.totalorder %s805_s2, %s514_s15  ;;  %p520_p8 = scmp.lt.u32.totalorder %s514_s15, %s805_s2 }
  0x90   : > { %p516_p0 = pnand %p515_p11, %p759_p9 }
  0x92   : > { %p517_p12 = pneg %p516_p0 }
  0x94   : > { %p522_p13 = pnand %p520_p8, %p517_p12 }
  0x96   : > { %525 = shalt.err (!%p522_p13)
}
  0x97   : > { %369 = dma.vmem_to_hbm [thread:$0]  (%p759_p9), %s261_s20, 128, %s805_s2, [#allocation4]  }
  0x98   : > { %559 = dma.done.wait (%p759_p9), [#allocation4], 128  }
  0x99   : > { %561 = vsyncadd (%p759_p9), [#allocation4], 4294967168 }
  0x9a PF: > { %s19_s14 = sadd.s32 1, %s584_s14   ;;  %s816_s9 = smov %s568_s10 }
  0x9b   : > { %p16_p7 = scmp.ge.s32.totalorder %s19_s14, 4   ;;  %s817_s10 = smov %s572_s11 }
  0x9c   : > { %s818_s11 = smov %s656_s21  ;;  %s819_s12 = smov %s580_s13 }
  0x9d   : > { %s820_s13 = smov %s822_s16  ;;  %18 = sbr.rel (!%p16_p7) target bundleno = 7 (0x7), region = 83 }
  0xa4   :  { %273 = vsyncpa [#allocation3], 1 }
  0xa5   :  { %275 = vsyncpa [#allocation3 + $0x1], 1 }
  0xa6   :  { %276 = vsyncpa [#allocation6], 1 }
  0xa7   :  { %278 = vsyncpa [#allocation6 + $0x1], 1 }
  0xa8   :  { %279 = vsyncpa [#allocation4], 1 }
  0xa9   :  { %281 = vsyncpa [#allocation4 + $0x1], 1 }

</bundles_post_ra>
